<compile_context>
chip_gen: v6e
topology: v6e:2x2x1
jax: 0.10.0
libtpu: 0.0.40
codegen_flags: <defaults>
</compile_context>

<pallas_src>
import functools

import jax
import jax.numpy as jnp
from jax.experimental import pallas as pl
from jax.experimental.pallas import tpu as pltpu

LN_EPS = 1e-6
NUM_PATCH_TOKENS = 196          # 196 patch tokens + class token = 197 in the torch module
NEG_INF = -1e30


# --------------------------------------------------------------------------- helpers
def _round_up(x, m):
    return ((x + m - 1) // m) * m


def _layernorm(x, g, b):
    m = jnp.mean(x, axis=-1, keepdims=True)
    c = x - m
    v = jnp.mean(c * c, axis=-1, keepdims=True)
    return c * jax.lax.rsqrt(v + LN_EPS) * g + b


def _gelu(x):
    # TODO(synk): torch nn.GELU default is erf-exact; tanh approximation used for TPU lowering safety.
    return jax.nn.gelu(x, approximate=True)


# --------------------------------------------------------------------------- projector matmul kernel
def _projector_matmul_kernel(x_ref, w_ref, b_ref, o_ref):
    # Single (B, I) x (I, P*H) matmul + bias + GELU.  Output is lane-dense (P*H
    # is a multiple of 128 at real sizes; 512 lanes in the demo).
    y = jnp.dot(x_ref[...].astype(jnp.bfloat16), w_ref[...],
                preferred_element_type=jnp.float32) + b_ref[...]
    o_ref[...] = _gelu(y).astype(o_ref.dtype)


# --------------------------------------------------------------------------- fused ViT kernel
def _fused_vit_kernel(ptok_ref, nmask_ref, base_ref,
                      pg_ref, pbe_ref, phw_ref, phb_ref, phg_ref, phbe_ref,
                      ln1g_ref, ln1b_ref,
                      wq_ref, bq_ref, wk_ref, bk_ref, wv_ref, bv_ref,
                      wo_ref, bo_ref, ln2g_ref, ln2b_ref,
                      w1_ref, b1_ref, w2_ref, b2_ref,
                      encg_ref, encb_ref,
                      hw1_ref, hb1_ref, hw2_ref, hb2_ref, hw3_ref, hb3_ref,
                      o_ref, tok_ref,
                      *, num_heads, projections, proj_depth, seq_len):
    layer = pl.program_id(1)
    num_layers = pl.num_programs(1)
    S = seq_len

    # ---- layer 0 only: finish projector (LN + hidden MLP) and assemble tokens ----
    @pl.when(layer == 0)
    def _init_tokens():
        y = ptok_ref[0]                                     # (P, H) f32 (matmul+bias+GELU done)
        y = _layernorm(y, pg_ref[...], pbe_ref[...])
        phw = phw_ref[...]
        phb = phb_ref[...]
        phg = phg_ref[...]
        phbe = phbe_ref[...]
        for d in range(proj_depth):
            y = jnp.dot(y.astype(jnp.bfloat16), phw[d],
                        preferred_element_type=jnp.float32) + phb[d:d + 1]
            y = _gelu(y)
            y = _layernorm(y, phg[d:d + 1], phbe[d:d + 1])
        H = y.shape[-1]
        parts = [jnp.zeros((1, H), jnp.float32), y]
        if S - 1 - projections > 0:
            parts.append(jnp.zeros((S - 1 - projections, H), jnp.float32))
        # base = [class_token; zeros] + pos_emb[:S]  (precomputed in the wrapper)
        tok_ref[...] = base_ref[...] + jnp.concatenate(parts, axis=0)

    # ---- encoder layer `layer`: pre-LN masked MHA + MLP, tokens stay resident ----
    x0 = tok_ref[...]                                       # (S, H) f32
    y = _layernorm(x0, ln1g_ref[0], ln1b_ref[0])
    yb = jnp.broadcast_to(y.astype(jnp.bfloat16), (num_heads,) + y.shape)     # (nh, S, H)

    qh = jnp.einsum('hsk,hkd->hsd', yb, wq_ref[0],
                    preferred_element_type=jnp.float32) + bq_ref[0]           # (nh, S, dh)
    kh = jnp.einsum('hsk,hkd->hsd', yb, wk_ref[0],
                    preferred_element_type=jnp.float32) + bk_ref[0]
    vh = jnp.einsum('hsk,hkd->hsd', yb, wv_ref[0],
                    preferred_element_type=jnp.float32) + bv_ref[0]
    dh = qh.shape[-1]
    qh = qh * (float(dh) ** -0.5)

    s = jnp.einsum('hqd,hkd->hqk', qh.astype(jnp.bfloat16), kh.astype(jnp.bfloat16),
                   preferred_element_type=jnp.float32)                        # (nh, S, S)
    s = s + nmask_ref[...]                                  # additive key-padding mask (0 / -1e30)
    m = jnp.max(s, axis=-1, keepdims=True)
    e = jnp.exp(s - m)
    p = e * pl.reciprocal(jnp.sum(e, axis=-1, keepdims=True), approx=True)
    ctx = jnp.einsum('hqk,hkd->hqd', p.astype(jnp.bfloat16), vh.astype(jnp.bfloat16),
                     preferred_element_type=jnp.float32)                      # (nh, S, dh)
    oh = jnp.einsum('hqd,hdo->hqo', ctx.astype(jnp.bfloat16), wo_ref[0],
                    preferred_element_type=jnp.float32)                       # (nh, S, H)
    attn = jnp.sum(oh, axis=0) + bo_ref[0]                                    # (S, H)
    x1 = x0 + attn

    y2 = _layernorm(x1, ln2g_ref[0], ln2b_ref[0])
    h1 = _gelu(jnp.dot(y2.astype(jnp.bfloat16), w1_ref[0],
                       preferred_element_type=jnp.float32) + b1_ref[0])
    h2 = jnp.dot(h1.astype(jnp.bfloat16), w2_ref[0],
                 preferred_element_type=jnp.float32) + b2_ref[0]
    x2 = x1 + h2
    tok_ref[...] = x2

    # ---- last layer only: final encoder LN on class token + MLP head + softmax ----
    @pl.when(layer == num_layers - 1)
    def _head():
        cls = _layernorm(x2[0:1, :], encg_ref[...], encb_ref[...])            # (1, H)
        h = jnp.dot(cls.astype(jnp.bfloat16), hw1_ref[...],
                    preferred_element_type=jnp.float32) + hb1_ref[...]
        h = jnp.maximum(h, 0.0)
        h = jnp.dot(h.astype(jnp.bfloat16), hw2_ref[...],
                    preferred_element_type=jnp.float32) + hb2_ref[...]
        h = jnp.maximum(h, 0.0)
        logits = jnp.dot(h.astype(jnp.bfloat16), hw3_ref[...],
                         preferred_element_type=jnp.float32) + hb3_ref[...]   # (1, OUT_PAD)
        mm = jnp.max(logits, axis=-1, keepdims=True)
        ee = jnp.exp(logits - mm)                           # padded columns (bias -1e30) -> exactly 0
        o_ref[...] = (ee / jnp.sum(ee, axis=-1, keepdims=True))[None].astype(o_ref.dtype)


# --------------------------------------------------------------------------- full model wrapper
def tabular_vision_transformer(x, params, *, projections, proj_depth, num_heads):
    B, I = x.shape
    H = params["cls_token"].shape[-1]
    P = projections
    assert H % num_heads == 0
    dh = H // num_heads
    bf16 = jnp.bfloat16

    # ---------- projector: single (B, I) x (I, P*H) matmul kernel, lane-dense output ----------
    pw_flat = jnp.transpose(params["proj_w"], (1, 0, 2)).reshape(I, P * H).astype(bf16)
    pb_flat = params["proj_b"].reshape(1, P * H)
    proj = pl.pallas_call(
        _projector_matmul_kernel,
        out_shape=jax.ShapeDtypeStruct((B, P * H), jnp.float32),
    )(x, pw_flat, pb_flat)
    ptok = proj.reshape(B, P, H)                            # layout plumbing outside the kernel

    # ---------- static sequence truncation: only 1+P tokens can affect the class token ----------
    S = _round_up(1 + P, 8)
    pos = params["pos_emb"][0]
    if S <= pos.shape[0]:
        pos_s = pos[:S]
    else:
        pos_s = jnp.concatenate([pos, jnp.zeros((S - pos.shape[0], H), jnp.float32)], axis=0)
    base = jnp.concatenate([params["cls_token"][0],
                            jnp.zeros((S - 1, H), jnp.float32)], axis=0) + pos_s     # (S, H)
    neg_mask = jnp.where(jnp.arange(S)[None, :] < (1 + P), 0.0, NEG_INF).astype(jnp.float32)

    # ---------- stack per-layer weights, split heads in the wrapper, cast matmul weights to bf16 ----------
    layers = params["layers"]
    L = len(layers)

    def st(name):
        return jnp.stack([lp[name] for lp in layers], axis=0)

    ln1g, ln1b = st("ln1_g"), st("ln1_b")                   # (L, 1, H)
    ln2g, ln2b = st("ln2_g"), st("ln2_b")
    bo, b2 = st("bo"), st("b2")                             # (L, 1, H)
    b1 = st("b1")                                           # (L, 1, M)
    wq = st("wq").reshape(L, H, num_heads, dh).transpose(0, 2, 1, 3).astype(bf16)     # (L, nh, H, dh)
    wk = st("wk").reshape(L, H, num_heads, dh).transpose(0, 2, 1, 3).astype(bf16)
    wv = st("wv").reshape(L, H, num_heads, dh).transpose(0, 2, 1, 3).astype(bf16)
    bq = st("bq").reshape(L, 1, num_heads, dh).transpose(0, 2, 1, 3)                  # (L, nh, 1, dh)
    bk = st("bk").reshape(L, 1, num_heads, dh).transpose(0, 2, 1, 3)
    bv = st("bv").reshape(L, 1, num_heads, dh).transpose(0, 2, 1, 3)
    wo = st("wo").reshape(L, num_heads, dh, H).astype(bf16)                           # (L, nh, dh, H)
    w1 = st("w1").astype(bf16)                              # (L, H, M)
    w2 = st("w2").astype(bf16)                              # (L, M, H)

    phw = params["proj_hw"].astype(bf16)                    # (D, H, H)
    phb, phg, phbe = params["proj_hb"], params["proj_hg"], params["proj_hbeta"]
    pg, pbeta = params["proj_ln_g"], params["proj_ln_b"]
    encg, encb = params["enc_ln_g"], params["enc_ln_b"]

    # head: pad logits to a lane-dense multiple of 128; padded columns get bias -1e30 -> prob 0
    OUT = params["head_w3"].shape[-1]
    OUT_PAD = _round_up(max(OUT, 1), 128)
    hw1 = params["head_w1"].astype(bf16)
    hw2 = params["head_w2"].astype(bf16)
    hb1, hb2 = params["head_b1"], params["head_b2"]
    if OUT_PAD > OUT:
        hw3 = jnp.concatenate(
            [params["head_w3"],
             jnp.zeros((params["head_w3"].shape[0], OUT_PAD - OUT), jnp.float32)], axis=1).astype(bf16)
        hb3 = jnp.concatenate(
            [params["head_b3"], jnp.full((1, OUT_PAD - OUT), NEG_INF, jnp.float32)], axis=1)
    else:
        hw3 = params["head_w3"].astype(bf16)
        hb3 = params["head_b3"]

    def rep(a):
        n = a.ndim
        return pl.BlockSpec(a.shape, lambda b, l, _n=n: (0,) * _n)

    def per_layer(a):
        n = a.ndim
        return pl.BlockSpec((1,) + a.shape[1:], lambda b, l, _n=n: (l,) + (0,) * (_n - 1))

    inputs = [ptok, neg_mask, base,
              pg, pbeta, phw, phb, phg, phbe,
              ln1g, ln1b, wq, bq, wk, bk, wv, bv, wo, bo, ln2g, ln2b, w1, b1, w2, b2,
              encg, encb, hw1, hb1, hw2, hb2, hw3, hb3]
    in_specs = ([pl.BlockSpec((1, P, H), lambda b, l: (b, 0, 0)),
                 rep(neg_mask), rep(base),
                 rep(pg), rep(pbeta), rep(phw), rep(phb), rep(phg), rep(phbe)]
                + [per_layer(a) for a in (ln1g, ln1b, wq, bq, wk, bk, wv, bv,
                                          wo, bo, ln2g, ln2b, w1, b1, w2, b2)]
                + [rep(a) for a in (encg, encb, hw1, hb1, hw2, hb2, hw3, hb3)])

    out = pl.pallas_call(
        functools.partial(_fused_vit_kernel, num_heads=num_heads, projections=P,
                          proj_depth=proj_depth, seq_len=S),
        grid=(B, L),
        in_specs=in_specs,
        out_specs=pl.BlockSpec((1, 1, OUT_PAD), lambda b, l: (b, 0, 0)),
        out_shape=jax.ShapeDtypeStruct((B, 1, OUT_PAD), jnp.float32),
        scratch_shapes=[pltpu.VMEM((S, H), jnp.float32)],   # resident token carry across layers
        compiler_params=pltpu.CompilerParams(
            dimension_semantics=("parallel", "arbitrary"),
            vmem_limit_bytes=48 * 1024 * 1024),
    )(*inputs)
    return out[:, 0, :OUT]                                  # (B, output_size) probabilities


# --------------------------------------------------------------------------- params
def init_params(key, *, input_size, output_size, projections, proj_depth,
                hidden_dim, num_layers, mlp_dim):
    keys = iter(jax.random.split(key, 32 + 8 * num_layers))

    def unif(shape):
        return jax.random.uniform(next(keys), shape, jnp.float32)

    def nrm(shape, scale=0.02):
        return scale * jax.random.normal(next(keys), shape, jnp.float32)

    p = {
        # Projector (torch.rand for projector/bias, as in the module)
        "proj_w": unif((projections, input_size, hidden_dim)),
        "proj_b": unif((projections, hidden_dim)),
        "proj_ln_g": jnp.ones((1, hidden_dim), jnp.float32),
        "proj_ln_b": jnp.zeros((1, hidden_dim), jnp.float32),
        "proj_hw": nrm((proj_depth, hidden_dim, hidden_dim)),
        "proj_hb": jnp.zeros((proj_depth, hidden_dim), jnp.float32),
        "proj_hg": jnp.ones((proj_depth, hidden_dim), jnp.float32),
        "proj_hbeta": jnp.zeros((proj_depth, hidden_dim), jnp.float32),
        # ViT pieces (synthetic deterministic init; no checkpoint load)
        "cls_token": nrm((1, 1, hidden_dim)),
        "pos_emb": nrm((1, NUM_PATCH_TOKENS + 1, hidden_dim)),
        "enc_ln_g": jnp.ones((1, hidden_dim), jnp.float32),
        "enc_ln_b": jnp.zeros((1, hidden_dim), jnp.float32),
        # Head
        "head_w1": nrm((hidden_dim, 128)),
        "head_b1": jnp.zeros((1, 128), jnp.float32),
        "head_w2": nrm((128, 128)),
        "head_b2": jnp.zeros((1, 128), jnp.float32),
        "head_w3": nrm((128, output_size)),
        "head_b3": jnp.zeros((1, output_size), jnp.float32),
    }
    layers = []
    for _ in range(num_layers):
        layers.append({
            "ln1_g": jnp.ones((1, hidden_dim), jnp.float32),
            "ln1_b": jnp.zeros((1, hidden_dim), jnp.float32),
            "wq": nrm((hidden_dim, hidden_dim)),
            "bq": jnp.zeros((1, hidden_dim), jnp.float32),
            "wk": nrm((hidden_dim, hidden_dim)),
            "bk": jnp.zeros((1, hidden_dim), jnp.float32),
            "wv": nrm((hidden_dim, hidden_dim)),
            "bv": jnp.zeros((1, hidden_dim), jnp.float32),
            "wo": nrm((hidden_dim, hidden_dim)),
            "bo": jnp.zeros((1, hidden_dim), jnp.float32),
            "ln2_g": jnp.ones((1, hidden_dim), jnp.float32),
            "ln2_b": jnp.zeros((1, hidden_dim), jnp.float32),
            "w1": nrm((hidden_dim, mlp_dim)),
            "b1": jnp.zeros((1, mlp_dim), jnp.float32),
            "w2": nrm((mlp_dim, hidden_dim)),
            "b2": jnp.zeros((1, hidden_dim), jnp.float32),
        })
    p["layers"] = layers
    return p


# --------------------------------------------------------------------------- main
if __name__ == "__main__":
    B = 2
    input_size = 16
    output_size = 3
    projections = 8
    proj_depth = 1
    hidden_dim = 64       # small stand-ins for ViT-B/16's 768 / 12 / 12 / 3072
    num_layers = 2
    num_heads = 4
    mlp_dim = 128

    key = jax.random.PRNGKey(0)
    pkey, xkey = jax.random.split(key)
    params = init_params(pkey,
                         input_size=input_size, output_size=output_size,
                         projections=projections, proj_depth=proj_depth,
                         hidden_dim=hidden_dim, num_layers=num_layers,
                         mlp_dim=mlp_dim)
    x = jax.random.normal(xkey, (B, input_size), jnp.float32)

    out = tabular_vision_transformer(x, params,
                                     projections=projections,
                                     proj_depth=proj_depth,
                                     num_heads=num_heads)
    out = jax.block_until_ready(out)

    assert out.shape == (B, output_size)
    assert bool(jnp.all(jnp.isfinite(out)))
    # rows are softmax distributions
    assert bool(jnp.allclose(jnp.sum(out, axis=1), 1.0, atol=1e-4))
    print("KERNEL_OK")
</pallas_src>

<mosaic_0001>
module attributes {stable_mosaic.version = 11 : i64} {
  func.func @_projector_matmul_kernel(%arg0: memref<2x16xf32, #tpu.memory_space<vmem>>, %arg1: memref<16x512xbf16, #tpu.memory_space<vmem>>, %arg2: memref<1x512xf32, #tpu.memory_space<vmem>>, %arg3: memref<2x512xf32, #tpu.memory_space<vmem>>) attributes {dimension_semantics = [], scalar_prefetch = 0 : i64, scratch_operands = 0 : i64, tpu.core_type = #tpu.core_type<tc>} {
    %c0 = arith.constant 0 : index
    %c0_0 = arith.constant 0 : index
    %0 = vector.load %arg0[%c0, %c0_0] : memref<2x16xf32, #tpu.memory_space<vmem>>, vector<2x16xf32>
    %1 = arith.truncf %0 : vector<2x16xf32> to vector<2x16xbf16>
    %c0_1 = arith.constant 0 : index
    %c0_2 = arith.constant 0 : index
    %2 = vector.load %arg1[%c0_1, %c0_2] : memref<16x512xbf16, #tpu.memory_space<vmem>>, vector<16x512xbf16>
    %cst = arith.constant dense<0.000000e+00> : vector<2x512xf32>
    %3 = tpu.matmul %1, %2, %cst {dimension_numbers = #tpu.dot_dimension_numbers<[1], [0], [0], [1], [0, 0, 1, 1], [], []>} : vector<2x16xbf16>, vector<16x512xbf16>, vector<2x512xf32> -> vector<2x512xf32>
    %c0_3 = arith.constant 0 : index
    %c0_4 = arith.constant 0 : index
    %4 = vector.load %arg2[%c0_3, %c0_4] : memref<1x512xf32, #tpu.memory_space<vmem>>, vector<1x512xf32>
    %5 = vector.broadcast %4 : vector<1x512xf32> to vector<2x512xf32>
    %6 = arith.addf %3, %5 : vector<2x512xf32>
    %7 = arith.mulf %6, %6 : vector<2x512xf32>
    %8 = arith.mulf %6, %7 : vector<2x512xf32>
    %cst_5 = arith.constant 4.471500e-02 : f32
    %9 = vector.broadcast %cst_5 : f32 to vector<2x512xf32>
    %10 = arith.mulf %9, %8 : vector<2x512xf32>
    %11 = arith.addf %6, %10 : vector<2x512xf32>
    %cst_6 = arith.constant 0.797884583 : f32
    %12 = vector.broadcast %cst_6 : f32 to vector<2x512xf32>
    %13 = arith.mulf %12, %11 : vector<2x512xf32>
    %14 = math.tanh %13 : vector<2x512xf32>
    %cst_7 = arith.constant 1.000000e+00 : f32
    %15 = vector.broadcast %cst_7 : f32 to vector<2x512xf32>
    %16 = arith.addf %15, %14 : vector<2x512xf32>
    %cst_8 = arith.constant 5.000000e-01 : f32
    %17 = vector.broadcast %cst_8 : f32 to vector<2x512xf32>
    %18 = arith.mulf %17, %16 : vector<2x512xf32>
    %19 = arith.mulf %6, %18 : vector<2x512xf32>
    %c0_9 = arith.constant 0 : index
    %c0_10 = arith.constant 0 : index
    %20 = vector.load %arg3[%c0_9, %c0_10] : memref<2x512xf32, #tpu.memory_space<vmem>>, vector<2x512xf32>
    tpu.vector_store %arg3[%c0_9, %c0_10], %19 {strides = array<i32>} : memref<2x512xf32, #tpu.memory_space<vmem>>, vector<2x512xf32>,
    return
  }
}

</mosaic_0001>

<bundles_post_ra>
// kernel: tpu_custom_call.1
= control target key start
LH: loop header
LB: loop body
LE: loop exit
PB: predicated region body
PF: predicated region fallthrough
CT: control target
= control target key end

     0   :  { %8 = vsyncpa [#allocation3], 0  ;;  %s423_s0 = inlined_call_operand.hbm [shape: f32[2,16], index: 0, kind: input, shape index: {}]   ;;  %s424_s1 = inlined_call_operand.hbm [shape: bf16[16,512], index: 1, kind: input, shape index: {}]   ;;  %s425_s2 = inlined_call_operand.hbm [shape: f32[1,512], index: 2, kind: input, shape index: {}]   ;;  %s426_s3 = inlined_call_operand.hbm [shape: f32[2,512], index: 3, kind: output, shape index: {}]  }
   0x1   :  { %9 = vsyncpa [#allocation6], 0 }
   0x2   :  { %10 = vsyncpa [#allocation4], 0  ;;  %s376_s12 = smov [#allocation5]  }
   0x3   :  { %s26_s13 = sshll.u32 %s376_s12, 4  ;;  %s27_s13 = int_to_ptr.vmem [resolvable:$true] %s26_s13 }
   0x4   :  { %s298_s14 = scalar_lea.vmem %s27_s13, 512  ;;  %p303_p1 = scmp.lt.s32.totalorder %s27_s13, %s27_s13 }
   0x5   :  { %p299_p0 = scmp.ne.s32.totalorder %s27_s13, %s298_s14  ;;  %p304_p2 = scmp.lt.s32.totalorder %s298_s14, %s298_s14 }
   0x7   :  { %p305_p3 = por %p304_p2, %p303_p1 }
   0x9   :  { %p306_p4 = pnand %p305_p3, %p299_p0 }
   0xb   :  { %309 = shalt.err (!%p306_p4)
}
   0xc   :  { %s377_s15 = smov 256   ;;  %s378_s16 = smov 16  }
   0xd   :  { %32 = dma.hbm_to_vmem [thread:$0]  %s424_s1, 512, %s27_s13, [#allocation6], %s377_s15, %s377_s15, %s378_s16  }
   0xe   :  { %s379_s19 = smov [#allocation2]   ;;  %s380_s21 = smov [#allocation7]  }
   0xf   :  { %s17_s20 = sshll.u32 %s379_s19, 4  ;;  %s39_s22 = sshll.u32 %s380_s21, 4  ;;  %s18_s20 = int_to_ptr.vmem [resolvable:$true] %s17_s20  ;;  %s40_s22 = int_to_ptr.vmem [resolvable:$true] %s39_s22 }
  0x10   :  { %s318_s23 = scalar_lea.vmem %s18_s20, 32  ;;  %p323_p6 = scmp.lt.s32.totalorder %s18_s20, %s18_s20 }
  0x11   :  { %p319_p5 = scmp.ne.s32.totalorder %s18_s20, %s318_s23  ;;  %p324_p7 = scmp.lt.s32.totalorder %s318_s23, %s318_s23 }
  0x13   :  { %p325_p8 = por %p324_p7, %p323_p6 }
  0x15   :  { %p326_p9 = pnand %p325_p8, %p319_p5 }
  0x17   :  { %329 = shalt.err (!%p326_p9)
}
  0x18   :  { %20 = dma.hbm_to_vmem [thread:$0]  %s423_s0, 32, %s18_s20, [#allocation3]  }
  0x19   :  { %s338_s26 = scalar_lea.vmem %s40_s22, 64  ;;  %p343_p11 = scmp.lt.s32.totalorder %s40_s22, %s40_s22 }
  0x1a   :  { %p339_p10 = scmp.ne.s32.totalorder %s40_s22, %s338_s26  ;;  %p344_p12 = scmp.lt.s32.totalorder %s338_s26, %s338_s26 }
  0x1c   :  { %p345_p13 = por %p344_p12, %p343_p11 }
  0x1e   :  { %p346_p0 = pnand %p345_p13, %p339_p10 }
  0x20   :  { %349 = shalt.err (!%p346_p0)
}
  0x21   :  { %42 = dma.hbm_to_vmem [thread:$0]  %s425_s2, 64, %s40_s22, [#allocation6]  }
  0x22   :  { %370 = dma.done.wait [#allocation3], 32  }
  0x23   :  { %371 = vsyncadd [#allocation3], 4294967264 }
  0x24   :  { %372 = dma.done.wait [#allocation6], 576  }
  0x25   :  { %373 = vsyncadd [#allocation6], 4294966720  ;;  %v381_v0 = vmov 0   ;;  %v276_v1 = vld [vmem:[#allocation5 + $0x4] ss:$16 sps:$4 sm:$0xff]   ;;  %vm101_vm0 = vcmask 130048   ;;  %v61_v7 = vlaneseq }
  0x26   :  { %137 = vmatprep.mubr.bf16.mxu0 %v381_v0  ;;  %178 = vmatprep.mubr.bf16.mxu1 %v381_v0  ;;  %v278_v2 = vld [vmem:[#allocation5 + $0xc] ss:$16 sps:$4 sm:$0xff]   ;;  %v280_v3 = vld [vmem:[#allocation5] ss:$16 sps:$4 sm:$0xff]   ;;  %v281_v4 = vld [vmem:[#allocation5 + $0x8] ss:$16 sps:$4 sm:$0xff]  }
  0x27   :  { %119 = vmatprep.subr.bf16.mxu0 %v276_v1  ;;  %v53_v5 = vld [vmem:[#allocation2] sm:$0x3]  ;;  %160 = vmatprep.subr.bf16.mxu1 %v278_v2  ;;  %v413_v8 = vshrl.u32 %v61_v7, 7  ;;  %v59_v11 = vld [vmem:[#allocation7] sm:$0xf]  ;;  %s383_s0 = smov [#allocation8]  }
  0x28   :  { %v54_v6 = vpack.c.bf16 %v53_v5, %v53_v5  ;;  %120 = vmatpush1.bf16.msra.mxu0 %v280_v3  ;;  %161 = vmatpush1.bf16.msra.mxu1 %v281_v4  ;;  %v382_v50 = vmov 1983009808   ;;  %s252_s2 = sshll.u32 %s383_s0, 4  ;;  %s253_s2 = int_to_ptr.vmem [resolvable:$true] %s252_s2 }
  0x29   :  { %v63_v9 = vsub.s32 0, %v413_v8  ;;  %v71_v10 = vsub.s32 2, %v413_v8  ;;  %v67_v12 = vsub.s32 1, %v413_v8  ;;  %v75_v13 = vsub.s32 3, %v413_v8  ;;  %s350_s28 = scalar_lea.vmem %s253_s2, 128  ;;  %p355_p2 = scmp.lt.s32.totalorder %s253_s2, %s253_s2 }
  0x2a   :  { %v230_v51 = vunpack.c.l.s4 %v382_v50  ;;  %p351_p1 = scmp.ne.s32.totalorder %s253_s2, %s350_s28  ;;  %p356_p3 = scmp.lt.s32.totalorder %s350_s28, %s350_s28 }
  0x2b   :  { %266 = vmatmul.mubr.msk.bf16.vlgmr.msra.gmra.mxu0 %vm101_vm0, %v54_v6  ;;  %267 = vmatmul.mubr.msk.bf16.vlgmr.msra.gmra.mxu1 %vm101_vm0, %v54_v6  ;;  %v64_v14 = vrot.slane %v59_v11, %v63_v9  ;;  %v72_v15 = vrot.slane %v59_v11, %v71_v10  ;;  %v68_v16 = vrot.slane %v59_v11, %v67_v12 }
  0x2c   :  { %v76_v17 = vrot.slane %v59_v11, %v75_v13  ;;  %v231_v60 = vunpack.c.0.s8 %v230_v51  ;;  %p357_p4 = por %p356_p3, %p355_p2 }
  0x2e   :  { %v234_v3 = vsub.s32 %v231_v60, %v413_v8  ;;  %p358_p5 = pnand %p357_p4, %p351_p1 }
  0xeb   :  { %v139_v18 = vpop.f32.mrf.mxu0  ;;  %v180_v19 = vpop.f32.mrf.mxu1 }
  0xec   :  { %v140_v20 = vadd.f32 %v139_v18, %v64_v14  ;;  %v181_v21 = vadd.f32 %v180_v19, %v72_v15 }
  0xed   :  { %v141_v22 = vpop.f32.mrf.mxu0  ;;  %v182_v23 = vpop.f32.mrf.mxu1 }
  0xee   :  { %v187_v24 = vmul.f32 %v140_v20, %v140_v20  ;;  %v189_v25 = vmul.f32 %v181_v21, %v181_v21  ;;  %v142_v26 = vadd.f32 %v141_v22, %v68_v16  ;;  %v183_v27 = vadd.f32 %v182_v23, %v76_v17 }
  0xef   :  { %v143_v28 = vpop.f32.mrf.mxu0  ;;  %v184_v29 = vpop.f32.mrf.mxu1 }
  0xf0   :  { %v191_v30 = vmul.f32 %v187_v24, %v140_v20  ;;  %v193_v31 = vmul.f32 %v189_v25, %v181_v21  ;;  %v188_v32 = vmul.f32 %v142_v26, %v142_v26  ;;  %v190_v33 = vmul.f32 %v183_v27, %v183_v27 }
  0xf1   :  { %v144_v34 = vpop.f32.mrf.mxu0  ;;  %v185_v35 = vpop.f32.mrf.mxu1 }
  0xf2   :  { %v195_v36 = vmul.f32 0.044715, %v191_v30  ;;  %v197_v37 = vmul.f32 0.044715, %v193_v31  ;;  %v192_v38 = vmul.f32 %v188_v32, %v142_v26  ;;  %v194_v39 = vmul.f32 %v190_v33, %v183_v27 }
  0xf4   :  { %v199_v40 = vadd.f32 %v195_v36, %v140_v20  ;;  %v201_v41 = vadd.f32 %v197_v37, %v181_v21  ;;  %v196_v42 = vmul.f32 0.044715, %v192_v38  ;;  %v198_v43 = vmul.f32 0.044715, %v194_v39 }
  0xf6   :  { %v203_v44 = vmul.f32 0.7978846, %v199_v40  ;;  %v205_v45 = vmul.f32 0.7978846, %v201_v41  ;;  %v200_v46 = vadd.f32 %v196_v42, %v142_v26  ;;  %v202_v47 = vadd.f32 %v198_v43, %v183_v27 }
  0xf8   :  { %282 = vtanh.f32 %v203_v44  ;;  %v204_v48 = vmul.f32 0.7978846, %v200_v46  ;;  %v206_v49 = vmul.f32 0.7978846, %v202_v47 }
  0xf9   :  { %284 = vtanh.f32 %v205_v45 }
  0xfa   :  { %286 = vtanh.f32 %v204_v48 }
  0xfb   :  { %288 = vtanh.f32 %v206_v49 }
 0x105   :  { %v283_v52 = vpop.eup %282 }
 0x106   :  { %v285_v53 = vpop.eup %284  ;;  %v211_v54 = vadd.f32 1.0, %v283_v52 }
 0x107   :  { %v287_v55 = vpop.eup %286  ;;  %v213_v56 = vadd.f32 1.0, %v285_v53 }
 0x108   :  { %v289_v57 = vpop.eup %288  ;;  %v215_v58 = vmul.f32 0.5, %v211_v54  ;;  %v212_v59 = vadd.f32 1.0, %v287_v55 }
 0x109   :  { %v217_v61 = vmul.f32 0.5, %v213_v56  ;;  %v214_v62 = vadd.f32 1.0, %v289_v57 }
 0x10a   :  { %v216_v63 = vmul.f32 0.5, %v212_v59  ;;  %v219_v1 = vmul.f32 %v215_v58, %v140_v20 }
 0x10b   :  { %v218_v0 = vmul.f32 0.5, %v214_v62  ;;  %v221_v4 = vmul.f32 %v217_v61, %v181_v21 }
 0x10c   :  { %v220_v2 = vmul.f32 %v216_v63, %v142_v26 }
 0x10d   :  { %v222_v5 = vmul.f32 %v218_v0, %v183_v27 }
 0x10e   :  { %v227_v6 = vcombine.low %v219_v1, %v220_v2 }
 0x10f   :  { %v228_v7 = vcombine.low %v221_v4, %v222_v5 }
 0x110   :  { %v235_v9 = vrot.slane %v227_v6, %v234_v3 }
 0x111   :  { %v242_v10 = vrot.slane %v228_v7, %v234_v3 }
 0x113   :  { %v243_v11 = vcombine.low %v235_v9, %v242_v10 }
 0x115   :  { %245 = vst [vmem:[#allocation8] sm:$0xff] %v243_v11 }
 0x116   :  { %361 = shalt.err (!%p358_p5)
}
 0x117   :  { %255 = dma.vmem_to_hbm [thread:$0]  %s253_s2, 128, %s426_s3, [#allocation4]  }
 0x118   :  { %374 = dma.done.wait [#allocation4], 128  }
 0x119   :  { %375 = vsyncadd [#allocation4], 4294967168 }
 0x11a   :  { %259 = vsyncpa [#allocation3], 1 }
 0x11b   :  { %260 = vsyncpa [#allocation6], 1 }
 0x11c   :  { %261 = vsyncpa [#allocation4], 1 }

</bundles_post_ra>
